<compile_context>
chip_gen: v5e
topology: v5e:2x2
jax: 0.10.0
libtpu: 0.0.40
codegen_flags: <defaults>
</compile_context>

<pallas_src>
import math
import functools

import jax
import jax.numpy as jnp
from jax import lax
from jax.experimental import pallas as pl
from jax.experimental.pallas import tpu as pltpu


# ---------------------------------------------------------------------------
# Phase 1: fused Q/K/V input projections.
# ---------------------------------------------------------------------------
def _qkv_proj_kernel(xq_ref, xk_ref, xv_ref,
                     wq_ref, bq_ref, wk_ref, bk_ref, wv_ref, bv_ref,
                     q_ref, k_ref, v_ref):
    q = jnp.dot(xq_ref[...], wq_ref[...],
                preferred_element_type=jnp.float32) + bq_ref[...]
    k = jnp.dot(xk_ref[...], wk_ref[...],
                preferred_element_type=jnp.float32) + bk_ref[...]
    v = jnp.dot(xv_ref[...], wv_ref[...],
                preferred_element_type=jnp.float32) + bv_ref[...]
    q_ref[...] = q.astype(q_ref.dtype)   # pre-scaled by 1/sqrt(d_k) via wq/bq
    k_ref[...] = k.astype(k_ref.dtype)
    v_ref[...] = v.astype(v_ref.dtype)


# ---------------------------------------------------------------------------
# Phase 2: flash attention (online softmax) + fused output projection.
# ---------------------------------------------------------------------------
def _attn_kernel(q_ref, k_ref, v_ref, wo_ref, bo_ref,
                 out_ref,
                 ctx_scr, m_scr, l_scr,
                 *, num_heads, d_k):
    ki = pl.program_id(2)
    nk = pl.num_programs(2)

    # ---- init once per (b, q-tile) ----------------------------------------
    @pl.when(ki == 0)
    def _():
        ctx_scr[...] = jnp.zeros(ctx_scr.shape, ctx_scr.dtype)
        m_scr[...] = jnp.full(m_scr.shape, -jnp.inf, m_scr.dtype)
        l_scr[...] = jnp.zeros(l_scr.shape, l_scr.dtype)

    q = q_ref[0]                                   # (tq, D)  bf16, pre-scaled
    k = k_ref[0]                                   # (tkv, D) bf16
    v = v_ref[0]                                   # (tkv, D) bf16

    # ---- online softmax per head ------------------------------------------
    # Heads stay a short static unroll: running stats/context live in VMEM
    # scratch (not carried jnp values), which bounds live ranges; the context
    # accumulator is head-major so every head writes at lane offset 0.
    for h in range(num_heads):
        s0 = h * d_k
        qh = q[:, s0:s0 + d_k]                     # (tq, d_k)
        kh = k[:, s0:s0 + d_k]                     # (tkv, d_k)
        vh = v[:, s0:s0 + d_k]                     # (tkv, d_k)

        # Contract last dims of both operands -> no explicit transpose.
        scores = lax.dot_general(
            qh, kh, (((1,), (1,)), ((), ())),
            preferred_element_type=jnp.float32)    # (tq, tkv) f32

        m_old = m_scr[h]                           # (tq, 1)
        m_new = jnp.maximum(m_old, jnp.max(scores, axis=-1, keepdims=True))
        alpha = jnp.exp(m_old - m_new)             # (tq, 1)
        p = jnp.exp(scores - m_new)                # (tq, tkv) f32

        l_scr[h] = alpha * l_scr[h] + jnp.sum(p, axis=-1, keepdims=True)
        m_scr[h] = m_new
        ctx_scr[h] = alpha * ctx_scr[h] + jnp.dot(
            p.astype(v.dtype), vh, preferred_element_type=jnp.float32)

    # ---- finalize: normalize + single fused output projection -------------
    @pl.when(ki == nk - 1)
    def _():
        inv_l = pl.reciprocal(l_scr[...], approx=True)      # (H, tq, 1), EUP
        ctx = ctx_scr[...] * inv_l                          # one (H,tq,d_k) mul
        # Assemble the lane-dense (tq, D) slab once per q-tile.
        ctx_slab = jnp.concatenate(
            [ctx[h] for h in range(num_heads)], axis=-1)    # (tq, D) f32
        out = jnp.dot(ctx_slab.astype(wo_ref.dtype), wo_ref[...],
                      preferred_element_type=jnp.float32) + bo_ref[...]
        out_ref[0] = out.astype(out_ref.dtype)


def _largest_divisor(n, cap):
    t = min(cap, n)
    while n % t:
        t -= 1
    return t


def multi_head_attention(xq, xk, xv, params, *, num_heads,
                         q_tile=128, kv_tile=256, proj_tile=256,
                         compute_dtype=jnp.bfloat16):
    """xq/xk/xv: (B, S, D) float32.  params: dict of projection weights/biases."""
    B, S, D = xq.shape
    assert D % num_heads == 0
    d_k = D // num_heads
    scale = 1.0 / math.sqrt(d_k)

    # Cast weights + activations to the MXU compute dtype ONCE in the wrapper
    # (halves every HBM->VMEM DMA).  Biases stay f32 (added to f32 accums).
    # Fold the 1/sqrt(d_k) score scale into the Q projection.
    wq = (params["wq"] * scale).astype(compute_dtype)
    bq = params["bq"] * scale
    wk = params["wk"].astype(compute_dtype)
    bk = params["bk"]
    wv = params["wv"].astype(compute_dtype)
    bv = params["bv"]
    wo = params["wo"].astype(compute_dtype)
    bo = params["bo"]

    xq_f = xq.reshape(B * S, D).astype(compute_dtype)
    xk_f = xk.reshape(B * S, D).astype(compute_dtype)
    xv_f = xv.reshape(B * S, D).astype(compute_dtype)

    # ---------------- Phase 1: Q/K/V projections ---------------------------
    M = B * S
    tm = _largest_divisor(M, proj_tile)

    row_spec = pl.BlockSpec((tm, D), lambda i: (i, 0))
    w_spec1 = pl.BlockSpec((D, D), lambda i: (0, 0))      # grid-invariant
    b_spec1 = pl.BlockSpec((1, D), lambda i: (0, 0))

    q_flat, k_flat, v_flat = pl.pallas_call(
        _qkv_proj_kernel,
        out_shape=(jax.ShapeDtypeStruct((M, D), compute_dtype),
                   jax.ShapeDtypeStruct((M, D), compute_dtype),
                   jax.ShapeDtypeStruct((M, D), compute_dtype)),
        grid_spec=pltpu.PrefetchScalarGridSpec(
            num_scalar_prefetch=0,
            grid=(M // tm,),
            in_specs=[row_spec, row_spec, row_spec,
                      w_spec1, b_spec1, w_spec1, b_spec1, w_spec1, b_spec1],
            out_specs=(row_spec, row_spec, row_spec)),
        compiler_params=pltpu.CompilerParams(
            dimension_semantics=("parallel",)),
    )(xq_f, xk_f, xv_f, wq, bq, wk, bk, wv, bv)

    q = q_flat.reshape(B, S, D)
    k = k_flat.reshape(B, S, D)
    v = v_flat.reshape(B, S, D)

    # ---------------- Phase 2: flash attention + output projection ---------
    tq = _largest_divisor(S, q_tile)
    tkv = _largest_divisor(S, kv_tile)
    nq, nkv = S // tq, S // tkv

    kernel = functools.partial(_attn_kernel, num_heads=num_heads, d_k=d_k)

    q_spec = pl.BlockSpec((1, tq, D), lambda b, qi, ki: (b, qi, 0))
    kv_spec = pl.BlockSpec((1, tkv, D), lambda b, qi, ki: (b, ki, 0))
    w_spec = pl.BlockSpec((D, D), lambda b, qi, ki: (0, 0))   # grid-invariant
    b_spec = pl.BlockSpec((1, D), lambda b, qi, ki: (0, 0))
    out_spec = pl.BlockSpec((1, tq, D), lambda b, qi, ki: (b, qi, 0))

    # Default VMEM limit (no vmem_limit_bytes override): with only WO resident
    # plus O(tile) scratch the footprint stays well inside v7x's 64 MiB.
    return pl.pallas_call(
        kernel,
        out_shape=jax.ShapeDtypeStruct((B, S, D), xq.dtype),
        grid_spec=pltpu.PrefetchScalarGridSpec(
            num_scalar_prefetch=0,
            grid=(B, nq, nkv),
            in_specs=[q_spec, kv_spec, kv_spec, w_spec, b_spec],
            out_specs=out_spec,
            scratch_shapes=[
                pltpu.VMEM((num_heads, tq, d_k), jnp.float32),  # ctx (head-major)
                pltpu.VMEM((num_heads, tq, 1), jnp.float32),    # running max
                pltpu.VMEM((num_heads, tq, 1), jnp.float32),    # running sum
            ]),
        compiler_params=pltpu.CompilerParams(
            dimension_semantics=("parallel", "parallel", "arbitrary")),
    )(q, k, v, wo, bo)


def _reference(xq, xk, xv, params, *, num_heads):
    """Pure-JAX fp32 re-implementation of the PyTorch forward (mask=None, eval)."""
    B, S, D = xq.shape
    d_k = D // num_heads

    def proj(x, w, b):
        return x @ w + b[0]

    def split_heads(x):  # (B, S, D) -> (B, H, S, d_k)
        return x.reshape(B, S, num_heads, d_k).transpose(0, 2, 1, 3)

    q = split_heads(proj(xq, params["wq"], params["bq"]))
    k = split_heads(proj(xk, params["wk"], params["bk"]))
    v = split_heads(proj(xv, params["wv"], params["bv"]))

    scores = jnp.einsum("bhqd,bhkd->bhqk", q, k) / math.sqrt(d_k)
    p = jax.nn.softmax(scores, axis=-1)
    ctx = jnp.einsum("bhqk,bhkd->bhqd", p, v)
    ctx = ctx.transpose(0, 2, 1, 3).reshape(B, S, D)
    return ctx @ params["wo"] + params["bo"][0]


def _init_params(key, model_dim):
    ks = jax.random.split(key, 8)
    bound = 1.0 / math.sqrt(model_dim)

    def u(k, shape):
        return jax.random.uniform(k, shape, jnp.float32, -bound, bound)

    return {
        "wq": u(ks[0], (model_dim, model_dim)), "bq": u(ks[1], (1, model_dim)),
        "wk": u(ks[2], (model_dim, model_dim)), "bk": u(ks[3], (1, model_dim)),
        "wv": u(ks[4], (model_dim, model_dim)), "bv": u(ks[5], (1, model_dim)),
        "wo": u(ks[6], (model_dim, model_dim)), "bo": u(ks[7], (1, model_dim)),
    }


if __name__ == "__main__":
    B, S, D, H = 2, 8, 32, 4   # batch, seq, model_dim, num heads (d_k = 8)

    key = jax.random.PRNGKey(0)
    kq, kk, kv, kp = jax.random.split(key, 4)
    xq = jax.random.normal(kq, (B, S, D), jnp.float32)
    xk = jax.random.normal(kk, (B, S, D), jnp.float32)
    xv = jax.random.normal(kv, (B, S, D), jnp.float32)
    params = _init_params(kp, D)

    out = multi_head_attention(xq, xk, xv, params, num_heads=H)
    out = jax.block_until_ready(out)

    ref = _reference(xq, xk, xv, params, num_heads=H)
    assert out.shape == (B, S, D)
    # bf16 MXU operands (f32 accumulate) + approx reciprocal -> looser tolerance
    # than the pure-fp32 reference.
    assert jnp.allclose(out, ref, atol=5e-2, rtol=5e-2), (
        "mismatch vs reference; max abs diff = %f"
        % float(jnp.max(jnp.abs(out - ref))))

    print("KERNEL_OK")
</pallas_src>

<mosaic_0001>
module attributes {stable_mosaic.version = 11 : i64} {
  func.func @_qkv_proj_kernel(%arg0: i32, %arg1: memref<16x32xbf16, #tpu.memory_space<vmem>>, %arg2: memref<16x32xbf16, #tpu.memory_space<vmem>>, %arg3: memref<16x32xbf16, #tpu.memory_space<vmem>>, %arg4: memref<32x32xbf16, #tpu.memory_space<vmem>>, %arg5: memref<1x32xf32, #tpu.memory_space<vmem>>, %arg6: memref<32x32xbf16, #tpu.memory_space<vmem>>, %arg7: memref<1x32xf32, #tpu.memory_space<vmem>>, %arg8: memref<32x32xbf16, #tpu.memory_space<vmem>>, %arg9: memref<1x32xf32, #tpu.memory_space<vmem>>, %arg10: memref<16x32xbf16, #tpu.memory_space<vmem>>, %arg11: memref<16x32xbf16, #tpu.memory_space<vmem>>, %arg12: memref<16x32xbf16, #tpu.memory_space<vmem>>) attributes {dimension_semantics = [#tpu.dimension_semantics<parallel>], iteration_bounds = array<i64: 1>, scalar_prefetch = 0 : i64, scratch_operands = 0 : i64, tpu.core_type = #tpu.core_type<tc>, window_params = [{transform_indices = @transform_0, window_bounds = array<i64: 16, 32>}, {transform_indices = @transform_1, window_bounds = array<i64: 16, 32>}, {transform_indices = @transform_2, window_bounds = array<i64: 16, 32>}, {pipeline_mode = #tpu.pipeline_mode<synchronous>, transform_indices = @transform_3, window_bounds = array<i64: 32, 32>}, {pipeline_mode = #tpu.pipeline_mode<synchronous>, transform_indices = @transform_4, window_bounds = array<i64: 1, 32>}, {pipeline_mode = #tpu.pipeline_mode<synchronous>, transform_indices = @transform_5, window_bounds = array<i64: 32, 32>}, {pipeline_mode = #tpu.pipeline_mode<synchronous>, transform_indices = @transform_6, window_bounds = array<i64: 1, 32>}, {pipeline_mode = #tpu.pipeline_mode<synchronous>, transform_indices = @transform_7, window_bounds = array<i64: 32, 32>}, {pipeline_mode = #tpu.pipeline_mode<synchronous>, transform_indices = @transform_8, window_bounds = array<i64: 1, 32>}, {transform_indices = @transform_9, window_bounds = array<i64: 16, 32>}, {transform_indices = @transform_10, window_bounds = array<i64: 16, 32>}, {transform_indices = @transform_11, window_bounds = array<i64: 16, 32>}]} {
    %c0 = arith.constant 0 : index
    %c0_0 = arith.constant 0 : index
    %0 = vector.load %arg1[%c0, %c0_0] : memref<16x32xbf16, #tpu.memory_space<vmem>>, vector<16x32xbf16>
    %c0_1 = arith.constant 0 : index
    %c0_2 = arith.constant 0 : index
    %1 = vector.load %arg4[%c0_1, %c0_2] : memref<32x32xbf16, #tpu.memory_space<vmem>>, vector<32x32xbf16>
    %cst = arith.constant dense<0.000000e+00> : vector<16x32xf32>
    %2 = tpu.matmul %0, %1, %cst {dimension_numbers = #tpu.dot_dimension_numbers<[1], [0], [0], [1], [0, 0, 1, 1], [], []>} : vector<16x32xbf16>, vector<32x32xbf16>, vector<16x32xf32> -> vector<16x32xf32>
    %c0_3 = arith.constant 0 : index
    %c0_4 = arith.constant 0 : index
    %3 = vector.load %arg5[%c0_3, %c0_4] : memref<1x32xf32, #tpu.memory_space<vmem>>, vector<1x32xf32>
    %4 = vector.broadcast %3 : vector<1x32xf32> to vector<16x32xf32>
    %5 = arith.addf %2, %4 : vector<16x32xf32>
    %c0_5 = arith.constant 0 : index
    %c0_6 = arith.constant 0 : index
    %6 = vector.load %arg2[%c0_5, %c0_6] : memref<16x32xbf16, #tpu.memory_space<vmem>>, vector<16x32xbf16>
    %c0_7 = arith.constant 0 : index
    %c0_8 = arith.constant 0 : index
    %7 = vector.load %arg6[%c0_7, %c0_8] : memref<32x32xbf16, #tpu.memory_space<vmem>>, vector<32x32xbf16>
    %cst_9 = arith.constant dense<0.000000e+00> : vector<16x32xf32>
    %8 = tpu.matmul %6, %7, %cst_9 {dimension_numbers = #tpu.dot_dimension_numbers<[1], [0], [0], [1], [0, 0, 1, 1], [], []>} : vector<16x32xbf16>, vector<32x32xbf16>, vector<16x32xf32> -> vector<16x32xf32>
    %c0_10 = arith.constant 0 : index
    %c0_11 = arith.constant 0 : index
    %9 = vector.load %arg7[%c0_10, %c0_11] : memref<1x32xf32, #tpu.memory_space<vmem>>, vector<1x32xf32>
    %10 = vector.broadcast %9 : vector<1x32xf32> to vector<16x32xf32>
    %11 = arith.addf %8, %10 : vector<16x32xf32>
    %c0_12 = arith.constant 0 : index
    %c0_13 = arith.constant 0 : index
    %12 = vector.load %arg3[%c0_12, %c0_13] : memref<16x32xbf16, #tpu.memory_space<vmem>>, vector<16x32xbf16>
    %c0_14 = arith.constant 0 : index
    %c0_15 = arith.constant 0 : index
    %13 = vector.load %arg8[%c0_14, %c0_15] : memref<32x32xbf16, #tpu.memory_space<vmem>>, vector<32x32xbf16>
    %cst_16 = arith.constant dense<0.000000e+00> : vector<16x32xf32>
    %14 = tpu.matmul %12, %13, %cst_16 {dimension_numbers = #tpu.dot_dimension_numbers<[1], [0], [0], [1], [0, 0, 1, 1], [], []>} : vector<16x32xbf16>, vector<32x32xbf16>, vector<16x32xf32> -> vector<16x32xf32>
    %c0_17 = arith.constant 0 : index
    %c0_18 = arith.constant 0 : index
    %15 = vector.load %arg9[%c0_17, %c0_18] : memref<1x32xf32, #tpu.memory_space<vmem>>, vector<1x32xf32>
    %16 = vector.broadcast %15 : vector<1x32xf32> to vector<16x32xf32>
    %17 = arith.addf %14, %16 : vector<16x32xf32>
    %18 = arith.truncf %5 : vector<16x32xf32> to vector<16x32xbf16>
    %c0_19 = arith.constant 0 : index
    %c0_20 = arith.constant 0 : index
    %19 = vector.load %arg10[%c0_19, %c0_20] : memref<16x32xbf16, #tpu.memory_space<vmem>>, vector<16x32xbf16>
    tpu.vector_store %arg10[%c0_19, %c0_20], %18 {strides = array<i32>} : memref<16x32xbf16, #tpu.memory_space<vmem>>, vector<16x32xbf16>,
    %20 = arith.truncf %11 : vector<16x32xf32> to vector<16x32xbf16>
    %c0_21 = arith.constant 0 : index
    %c0_22 = arith.constant 0 : index
    %21 = vector.load %arg11[%c0_21, %c0_22] : memref<16x32xbf16, #tpu.memory_space<vmem>>, vector<16x32xbf16>
    tpu.vector_store %arg11[%c0_21, %c0_22], %20 {strides = array<i32>} : memref<16x32xbf16, #tpu.memory_space<vmem>>, vector<16x32xbf16>,
    %22 = arith.truncf %17 : vector<16x32xf32> to vector<16x32xbf16>
    %c0_23 = arith.constant 0 : index
    %c0_24 = arith.constant 0 : index
    %23 = vector.load %arg12[%c0_23, %c0_24] : memref<16x32xbf16, #tpu.memory_space<vmem>>, vector<16x32xbf16>
    tpu.vector_store %arg12[%c0_23, %c0_24], %22 {strides = array<i32>} : memref<16x32xbf16, #tpu.memory_space<vmem>>, vector<16x32xbf16>,
    return
  }
  func.func @transform_0(%arg0: i32) -> (i32, i32) {
    %c0_i32 = arith.constant 0 : i32
    %c0_i32_0 = arith.constant 0 : i32
    return %arg0, %c0_i32 : i32, i32
  }
  func.func @transform_1(%arg0: i32) -> (i32, i32) {
    %c0_i32 = arith.constant 0 : i32
    %c0_i32_0 = arith.constant 0 : i32
    return %arg0, %c0_i32 : i32, i32
  }
  func.func @transform_2(%arg0: i32) -> (i32, i32) {
    %c0_i32 = arith.constant 0 : i32
    %c0_i32_0 = arith.constant 0 : i32
    return %arg0, %c0_i32 : i32, i32
  }
  func.func @transform_3(%arg0: i32) -> (i32, i32) {
    %c0_i32 = arith.constant 0 : i32
    %c0_i32_0 = arith.constant 0 : i32
    %c0_i32_1 = arith.constant 0 : i32
    return %c0_i32, %c0_i32_0 : i32, i32
  }
  func.func @transform_4(%arg0: i32) -> (i32, i32) {
    %c0_i32 = arith.constant 0 : i32
    %c0_i32_0 = arith.constant 0 : i32
    %c0_i32_1 = arith.constant 0 : i32
    return %c0_i32, %c0_i32_0 : i32, i32
  }
  func.func @transform_5(%arg0: i32) -> (i32, i32) {
    %c0_i32 = arith.constant 0 : i32
    %c0_i32_0 = arith.constant 0 : i32
    %c0_i32_1 = arith.constant 0 : i32
    return %c0_i32, %c0_i32_0 : i32, i32
  }
  func.func @transform_6(%arg0: i32) -> (i32, i32) {
    %c0_i32 = arith.constant 0 : i32
    %c0_i32_0 = arith.constant 0 : i32
    %c0_i32_1 = arith.constant 0 : i32
    return %c0_i32, %c0_i32_0 : i32, i32
  }
  func.func @transform_7(%arg0: i32) -> (i32, i32) {
    %c0_i32 = arith.constant 0 : i32
    %c0_i32_0 = arith.constant 0 : i32
    %c0_i32_1 = arith.constant 0 : i32
    return %c0_i32, %c0_i32_0 : i32, i32
  }
  func.func @transform_8(%arg0: i32) -> (i32, i32) {
    %c0_i32 = arith.constant 0 : i32
    %c0_i32_0 = arith.constant 0 : i32
    %c0_i32_1 = arith.constant 0 : i32
    return %c0_i32, %c0_i32_0 : i32, i32
  }
  func.func @transform_9(%arg0: i32) -> (i32, i32) {
    %c0_i32 = arith.constant 0 : i32
    %c0_i32_0 = arith.constant 0 : i32
    return %arg0, %c0_i32 : i32, i32
  }
  func.func @transform_10(%arg0: i32) -> (i32, i32) {
    %c0_i32 = arith.constant 0 : i32
    %c0_i32_0 = arith.constant 0 : i32
    return %arg0, %c0_i32 : i32, i32
  }
  func.func @transform_11(%arg0: i32) -> (i32, i32) {
    %c0_i32 = arith.constant 0 : i32
    %c0_i32_0 = arith.constant 0 : i32
    return %arg0, %c0_i32 : i32, i32
  }
}

</mosaic_0001>

<bundles_post_ra>
// kernel: tpu_custom_call.1
= control target key start
LH: loop header
LB: loop body
LE: loop exit
PB: predicated region body
PF: predicated region fallthrough
CT: control target
= control target key end

     0   :  { %17 = vsyncpa [#allocation3], 0  ;;  %s765_s0 = inlined_call_operand.hbm [shape: bf16[16,32], index: 0, kind: input, shape index: {}]   ;;  %s766_s1 = inlined_call_operand.hbm [shape: bf16[16,32], index: 1, kind: input, shape index: {}]   ;;  %s767_s2 = inlined_call_operand.hbm [shape: bf16[16,32], index: 2, kind: input, shape index: {}]   ;;  %s768_s3 = inlined_call_operand.hbm [shape: bf16[32,32], index: 3, kind: input, shape index: {}]   ;;  %s769_s4 = inlined_call_operand.vmem [shape: f32[1,32], index: 4, kind: input, shape index: {}]   ;;  %s770_s5 = inlined_call_operand.hbm [shape: bf16[32,32], index: 5, kind: input, shape index: {}]   ;;  %s771_s6 = inlined_call_operand.vmem [shape: f32[1,32], index: 6, kind: input, shape index: {}]   ;;  %s772_s7 = inlined_call_operand.hbm [shape: bf16[32,32], index: 7, kind: input, shape index: {}]   ;;  %s773_s8 = inlined_call_operand.vmem [shape: f32[1,32], index: 8, kind: input, shape index: {}]   ;;  %s774_s9 = inlined_call_operand.hbm [shape: bf16[16,32], index: 9, kind: output, shape index: {0}]   ;;  %s775_s10 = inlined_call_operand.hbm [shape: bf16[16,32], index: 10, kind: output, shape index: {1}]   ;;  %s776_s11 = inlined_call_operand.hbm [shape: bf16[16,32], index: 11, kind: output, shape index: {2}]  }
   0x1   :  { %18 = vsyncpa [#allocation6], 0 }
   0x2   :  { %19 = vsyncpa [#allocation9], 0 }
   0x3   :  { %20 = vsyncpa [#allocation12], 0 }
   0x4   :  { %21 = vsyncpa [#allocation4], 0 }
   0x5   :  { %22 = vsyncpa [#allocation15], 0  ;;  %s40_s19 = sshll.u32 %s766_s1, 4  ;;  %s625_s20 = smov [#allocation5]   ;;  %s41_s19 = int_to_ptr.hbm [resolvable:$true] %s40_s19 }
   0x6   :  { %s42_s21 = sshll.u32 %s625_s20, 4  ;;  %s66_s24 = sshll.u32 %s768_s3, 4  ;;  %s43_s21 = int_to_ptr.vmem [resolvable:$true] %s42_s21  ;;  %s67_s24 = int_to_ptr.hbm [resolvable:$true] %s66_s24 }
   0x7   :  { %s626_s25 = smov 64   ;;  %s627_s26 = smov 4  }
   0x8   :  { %48 = dma.hbm_to_vmem [thread:$0]  %s41_s19, 128, %s43_s21, [#allocation6], %s626_s25, %s626_s25, %s627_s26  }
   0x9   :  { %s628_s27 = smov [#allocation8]   ;;  %s27_s1 = sshll.u32 %s765_s0, 4  ;;  %s28_s1 = int_to_ptr.hbm [resolvable:$true] %s27_s1 }
   0xa   :  { %s68_s28 = sshll.u32 %s628_s27, 4  ;;  %s53_s13 = sshll.u32 %s767_s2, 4  ;;  %s69_s28 = int_to_ptr.vmem [resolvable:$true] %s68_s28  ;;  %s54_s13 = int_to_ptr.hbm [resolvable:$true] %s53_s13 }
   0xb   :  { %74 = dma.hbm_to_vmem [thread:$0]  %s67_s24, 256, %s69_s28, [#allocation9], %s626_s25, %s626_s25, %s627_s26  }
   0xc   :  { %s629_s14 = smov [#allocation2]   ;;  %s630_s16 = smov [#allocation7]  }
   0xd   :  { %s29_s15 = sshll.u32 %s629_s14, 4  ;;  %s55_s0 = sshll.u32 %s630_s16, 4  ;;  %s30_s15 = int_to_ptr.vmem [resolvable:$true] %s29_s15  ;;  %s56_s0 = int_to_ptr.vmem [resolvable:$true] %s55_s0 }
   0xe   :  { %35 = dma.hbm_to_vmem [thread:$0]  %s28_s1, 128, %s30_s15, [#allocation3], %s626_s25, %s626_s25, %s627_s26  }
   0xf   :  { %s81_s19 = sshll.u32 %s770_s5, 4  ;;  %s96_s21 = sshll.u32 %s772_s7, 4  ;;  %s82_s19 = int_to_ptr.hbm [resolvable:$true] %s81_s19  ;;  %s97_s21 = int_to_ptr.hbm [resolvable:$true] %s96_s21 }
  0x10   :  { %61 = dma.hbm_to_vmem [thread:$0]  %s54_s13, 128, %s56_s0, [#allocation6], %s626_s25, %s626_s25, %s627_s26  }
  0x11   :  { %s631_s22 = smov [#allocation10]   ;;  %s632_s24 = smov [#allocation11]  }
  0x12   :  { %s83_s23 = sshll.u32 %s631_s22, 4  ;;  %s98_s5 = sshll.u32 %s632_s24, 4  ;;  %s84_s23 = int_to_ptr.vmem [resolvable:$true] %s83_s23  ;;  %s99_s5 = int_to_ptr.vmem [resolvable:$true] %s98_s5 }
  0x13   :  { %89 = dma.hbm_to_vmem [thread:$0]  %s82_s19, 256, %s84_s23, [#allocation9], %s626_s25, %s626_s25, %s627_s26  }
  0x14   :  { %104 = dma.hbm_to_vmem [thread:$0]  %s97_s21, 256, %s99_s5, [#allocation12], %s626_s25, %s626_s25, %s627_s26  }
  0x15   :  { %613 = dma.done.wait [#allocation3], 128  }
  0x16   :  { %614 = vsyncadd [#allocation3], 4294967168 }
  0x17   :  { %615 = dma.done.wait [#allocation6], 256  }
  0x18   :  { %616 = vsyncadd [#allocation6], 4294967040 }
  0x19   :  { %617 = dma.done.wait [#allocation9], 512  }
  0x1a   :  { %618 = vsyncadd [#allocation9], 4294966784 }
  0x1b   :  { %619 = dma.done.wait [#allocation12], 256  }
  0x1c   :  { %620 = vsyncadd [#allocation12], 4294967040  ;;  %v376_v0 = vld [vmem:[#allocation8 + $0x8] sm:$0xff]  ;;  %v379_v1 = vld [vmem:[#allocation10 + $0x8] sm:$0xff]  ;;  %vm159_vm0 = vcmask 261120   ;;  %vm267_vm1 = vcmask 257024  }
  0x1d   :  { %v382_v2 = vld [vmem:[#allocation11 + $0x8] sm:$0xff]  ;;  %169 = vmatpush.bf16.msra.mxu0 %v376_v0  ;;  %213 = vmatpush.bf16.msra.mxu1 %v379_v1  ;;  %v375_v3 = vld [vmem:[#allocation8] sm:$0xff]  ;;  %v378_v4 = vld [vmem:[#allocation10] sm:$0xff]  ;;  %s284_s13 = sshll.u32 %s774_s9, 4  ;;  %s634_s14 = smov [#allocation14]   ;;  %s285_s13 = int_to_ptr.hbm [resolvable:$true] %s284_s13 }
  0x1e   :  { %257 = vmatpush.bf16.msra.mxu2 %v382_v2  ;;  %v381_v5 = vld [vmem:[#allocation11] sm:$0xff]  ;;  %v374_v6 = vld [vmem:[#allocation2] sm:$0xff]  ;;  %v377_v7 = vld [vmem:[#allocation5] sm:$0xff]  ;;  %s295_s15 = sshll.u32 %s634_s14, 4  ;;  %s297_s0 = sshll.u32 %s775_s10, 4  ;;  %s296_s15 = int_to_ptr.vmem [resolvable:$true] %s295_s15  ;;  %s298_s0 = int_to_ptr.hbm [resolvable:$true] %s297_s0 }
  0x1f   :  { %v380_v8 = vld [vmem:[#allocation7] sm:$0xff]  ;;  %v394_v9 = vld [vmem:[%s769_s4] ss:$0 sm:$0xff]  ;;  %s633_s4 = smov [#allocation13]   ;;  %s635_s9 = smov [#allocation16]  }
  0x20   :  { %v395_v10 = vld [vmem:[%s771_s6] ss:$0 sm:$0xff]  ;;  %s282_s6 = sshll.u32 %s633_s4, 4  ;;  %s308_s17 = sshll.u32 %s635_s9, 4  ;;  %s283_s6 = int_to_ptr.vmem [resolvable:$true] %s282_s6  ;;  %s309_s17 = int_to_ptr.vmem [resolvable:$true] %s308_s17 }
  0x21   :  { %170 = vmatpush.bf16.msra.mxu0 %v375_v3  ;;  %214 = vmatpush.bf16.msra.mxu1 %v378_v4  ;;  %v396_v17 = vld [vmem:[%s773_s8] ss:$0 sm:$0xff]  ;;  %s310_s2 = sshll.u32 %s776_s11, 4  ;;  %s311_s2 = int_to_ptr.hbm [resolvable:$true] %s310_s2 }
  0x22   :  { %258 = vmatpush.bf16.msra.mxu2 %v381_v5 }
  0x24   :  { %347 = vmatmul.msk.bf16.vlgmr.msra.gmra.mxu0 %vm159_vm0, %v374_v6  ;;  %360 = vmatmul.msk.bf16.vlgmr.msra.gmra.mxu1 %vm159_vm0, %v377_v7 }
  0x25   :  { %373 = vmatmul.msk.bf16.vlgmr.msra.gmra.mxu2 %vm159_vm0, %v380_v8 }
  0xa1   :  { %v172_v11 = vpop.f32.mrf.mxu0  ;;  %v216_v12 = vpop.f32.mrf.mxu1 }
  0xa2   :  { %v173_v13 = vadd.f32 %v394_v9, %v172_v11  ;;  %v217_v14 = vadd.f32 %v395_v10, %v216_v12 }
  0xa4   :  { %v265_v15 = vpack.c.bf16 %v173_v13, %v173_v13  ;;  %v270_v16 = vpack.c.bf16 %v217_v14, %v217_v14 }
  0xa6   :  { %268 = vst.msk [vmem:[#allocation13] sm:$0xf] %vm267_vm1, %v265_v15 }
  0xa7   :  { %272 = vst.msk [vmem:[#allocation14] sm:$0xf] %vm267_vm1, %v270_v16 }
  0xa8   :  { %v260_v18 = vpop.f32.mrf.mxu2 }
  0xa9   :  { %v261_v19 = vadd.f32 %v396_v17, %v260_v18  ;;  %v174_v20 = vpop.f32.mrf.mxu0  ;;  %v218_v21 = vpop.f32.mrf.mxu1 }
  0xaa   :  { %v175_v22 = vadd.f32 %v394_v9, %v174_v20  ;;  %v219_v23 = vadd.f32 %v395_v10, %v218_v21 }
  0xab   :  { %v274_v24 = vpack.c.bf16 %v261_v19, %v261_v19 }
  0xac   :  { %v266_v25 = vpack.c.bf16 %v175_v22, %v175_v22  ;;  %v271_v26 = vpack.c.bf16 %v219_v23, %v219_v23 }
  0xad   :  { %276 = vst.msk [vmem:[#allocation16] sm:$0xf] %vm267_vm1, %v274_v24 }
  0xae   :  { %269 = vst.msk [vmem:[#allocation13 + $0x4] sm:$0xf] %vm267_vm1, %v266_v25 }
  0xaf   :  { %273 = vst.msk [vmem:[#allocation14 + $0x4] sm:$0xf] %vm267_vm1, %v271_v26  ;;  %290 = dma.vmem_to_hbm [thread:$0]  %s283_s6, 128, %s285_s13, [#allocation4], %s626_s25, %s626_s25, %s627_s26  }
  0xb0   :  { %v262_v27 = vpop.f32.mrf.mxu2  ;;  %303 = dma.vmem_to_hbm [thread:$0]  %s296_s15, 128, %s298_s0, [#allocation15], %s626_s25, %s626_s25, %s627_s26  }
  0xb1   :  { %v263_v28 = vadd.f32 %v396_v17, %v262_v27 }
  0xb3   :  { %v275_v29 = vpack.c.bf16 %v263_v28, %v263_v28 }
  0xb5   :  { %277 = vst.msk [vmem:[#allocation16 + $0x4] sm:$0xf] %vm267_vm1, %v275_v29 }
  0xb6   :  { %316 = dma.vmem_to_hbm [thread:$0]  %s309_s17, 128, %s311_s2, [#allocation15], %s626_s25, %s626_s25, %s627_s26  }
  0xb7   :  { %621 = dma.done.wait [#allocation4], 128  }
  0xb8   :  { %622 = vsyncadd [#allocation4], 4294967168 }
  0xb9   :  { %623 = dma.done.wait [#allocation15], 256  }
  0xba   :  { %624 = vsyncadd [#allocation15], 4294967040 }
  0xbb   :  { %329 = vsyncpa [#allocation3], 1 }
  0xbc   :  { %330 = vsyncpa [#allocation6], 1 }
  0xbd   :  { %331 = vsyncpa [#allocation9], 1 }
  0xbe   :  { %332 = vsyncpa [#allocation12], 1 }
  0xbf   :  { %333 = vsyncpa [#allocation4], 1 }
  0xc0   :  { %334 = vsyncpa [#allocation15], 1 }

</bundles_post_ra>
